<compile_context>
chip_gen: v5e
topology: v5e:2x2
jax: 0.10.0
libtpu: 0.0.40
codegen_flags: <defaults>
</compile_context>

<pallas_src>
import functools

import jax
import jax.numpy as jnp
from jax import lax
from jax.experimental import pallas as pl
from jax.experimental.pallas import tpu as pltpu


def _gkd_kernel(stu_ref, tea_ref, lab_ref, kl_ref, cnt_ref, *, temp):
    tn, c = stu_ref.shape

    inv_t = 1.0 / temp
    s = stu_ref[...].astype(jnp.float32) * inv_t          # [TN, C]
    t = tea_ref[...].astype(jnp.float32) * inv_t          # [TN, C]

    # student log-softmax pieces
    s_max = jnp.max(s, axis=1, keepdims=True)             # [TN, 1]
    s_shift = s - s_max                                    # [TN, C]
    s_lse = jnp.log(jnp.sum(jnp.exp(s_shift), axis=1, keepdims=True))  # [TN, 1]

    # teacher softmax pieces
    t_max = jnp.max(t, axis=1, keepdims=True)              # [TN, 1]
    t_shift = t - t_max                                     # [TN, C]
    t_exp = jnp.exp(t_shift)                                # [TN, C]
    t_sum = jnp.sum(t_exp, axis=1, keepdims=True)           # [TN, 1]

    # KL(t || s) per row without materializing log_t / log_s / t_prob:
    #   sum_c t_prob*(t_shift - s_shift) - (log t_sum - s_lse)
    dot = jnp.sum(t_exp * (t_shift - s_shift), axis=1, keepdims=True)  # [TN, 1]
    row_kl = dot / t_sum - (jnp.log(t_sum) - s_lse)                    # [TN, 1]

    # Agreement mask: teacher's row max sits at the label column.
    # (Matches argmax first-index semantics except on exact logit ties.)
    col = lax.broadcasted_iota(jnp.int32, (tn, c), 1)       # [TN, C]
    label = lab_ref[...].astype(jnp.int32)                  # [TN, 1]
    at_label_is_max = (t == t_max) & (col == label)         # [TN, C]
    mask = jnp.max(at_label_is_max.astype(jnp.float32), axis=1, keepdims=True)  # [TN,1]

    # Per-block partial sums (finalized in the JAX wrapper).
    kl_ref[...] = jnp.sum(mask * row_kl, axis=0, keepdims=True)[None]   # (1,1,1)
    cnt_ref[...] = jnp.sum(mask, axis=0, keepdims=True)[None]           # (1,1,1)


def _pick_row_tile(n, c, itemsize):
    """Biggest row tile (multiple of 8, <=1024) that keeps double-buffered
    input blocks + in-kernel f32 temporaries within a conservative ~40 MiB
    budget (safe on v5e/v6e 128 MiB and v7x 64 MiB VMEM)."""
    budget = 40 * 1024 * 1024
    per_row = c * (4 * itemsize + 6 * 4) + 16   # 2 inputs x 2 bufs + f32 temps
    cap = max(8, budget // per_row)
    cap = min(cap, 1024)
    n8 = ((n + 7) // 8) * 8
    tile = min(cap, n8)
    return max(8, (tile // 8) * 8)


def gkd_loss(stu_pred, tea_pred, label, temperature, *, row_tile=None):
    """stu_pred, tea_pred: [N, C] float (any float dtype); label: [N] int.
    Returns scalar f32 loss matching the PyTorch GKDLoss forward."""
    n, c = stu_pred.shape
    assert tea_pred.shape == (n, c)
    itemsize = jnp.dtype(stu_pred.dtype).itemsize

    tile = row_tile if row_tile is not None else _pick_row_tile(n, c, itemsize)
    tile = max(8, (int(tile) // 8) * 8)
    n_pad = ((n + tile - 1) // tile) * tile
    g = n_pad // tile

    lab2d = label.astype(jnp.int32).reshape(n, 1)
    if n_pad != n:
        pad = n_pad - n
        stu_pred = jnp.pad(stu_pred, ((0, pad), (0, 0)))
        tea_pred = jnp.pad(tea_pred, ((0, pad), (0, 0)))
        # label = -1 for padded rows -> never matches a column -> mask 0.
        lab2d = jnp.pad(lab2d, ((0, pad), (0, 0)), constant_values=-1)

    # VMEM budget hint: double-buffered input blocks + f32 working set.
    block_in_bytes = 2 * tile * c * itemsize
    needed = 2 * (block_in_bytes + tile * 4) + 6 * tile * c * 4 + (1 << 20)
    vmem_limit = int(min(56 * 1024 * 1024, max(32 * 1024 * 1024, needed)))

    cost = pl.CostEstimate(
        flops=10 * n_pad * c,
        transcendentals=2 * n_pad * c,
        bytes_accessed=2 * n_pad * c * itemsize + n_pad * 4 + 2 * g * 4,
    )

    kl_part, cnt_part = pl.pallas_call(
        functools.partial(_gkd_kernel, temp=float(temperature)),
        out_shape=(
            jax.ShapeDtypeStruct((g, 1, 1), jnp.float32),
            jax.ShapeDtypeStruct((g, 1, 1), jnp.float32),
        ),
        grid=(g,),
        in_specs=[
            pl.BlockSpec((tile, c), lambda i: (i, 0)),
            pl.BlockSpec((tile, c), lambda i: (i, 0)),
            pl.BlockSpec((tile, 1), lambda i: (i, 0)),
        ],
        out_specs=(
            pl.BlockSpec((1, 1, 1), lambda i: (i, 0, 0)),
            pl.BlockSpec((1, 1, 1), lambda i: (i, 0, 0)),
        ),
        compiler_params=pltpu.CompilerParams(
            dimension_semantics=("parallel",),
            vmem_limit_bytes=vmem_limit,
        ),
        cost_estimate=cost,
    )(stu_pred, tea_pred, lab2d)

    kl_sum = jnp.sum(kl_part)
    count = jnp.sum(cnt_part)
    t_ = float(temperature)
    return kl_sum * (t_ * t_) / (count + 1e-06)


def _gkd_loss_ref(stu_pred, tea_pred, label, temperature):
    """Pure-JAX reference mirroring the PyTorch module."""
    t_ = float(temperature)
    s = jax.nn.log_softmax(stu_pred / t_, axis=1)
    t = jax.nn.softmax(tea_pred / t_, axis=1)
    t_argmax = jnp.argmax(t, axis=1)
    mask = (label == t_argmax).astype(jnp.float32)
    count = jnp.sum(mask)
    kl = jnp.sum(mask[:, None] * t * (jnp.log(t) - s))
    return kl * t_ * t_ / (count + 1e-06)


if __name__ == "__main__":
    T = 4.0
    key = jax.random.PRNGKey(0)
    k1, k2, k3, k4, k5, k6 = jax.random.split(key, 6)

    # --- Test 1: small f32 case, single block -------------------------------
    N, C = 8, 128
    stu = jax.random.normal(k1, (N, C), dtype=jnp.float32)
    tea = jax.random.normal(k2, (N, C), dtype=jnp.float32)
    rand_lab = jax.random.randint(k3, (N,), 0, C, dtype=jnp.int32)
    tea_arg = jnp.argmax(tea, axis=1).astype(jnp.int32)
    agree = jnp.arange(N) % 2 == 0
    label = jnp.where(agree, tea_arg, rand_lab)

    loss = jax.block_until_ready(gkd_loss(stu, tea, label, T))
    ref = _gkd_loss_ref(stu, tea, label, T)
    assert jnp.allclose(loss, ref, rtol=1e-5, atol=1e-5), (loss, ref)

    # --- Test 2: bf16 ingest, multi-block grid, row padding, odd C ----------
    N2, C2 = 40, 96
    stu2 = jax.random.normal(k4, (N2, C2), dtype=jnp.float32).astype(jnp.bfloat16)
    tea2 = jax.random.normal(k5, (N2, C2), dtype=jnp.float32).astype(jnp.bfloat16)
    rand_lab2 = jax.random.randint(k6, (N2,), 0, C2, dtype=jnp.int32)
    tea_arg2 = jnp.argmax(tea2.astype(jnp.float32), axis=1).astype(jnp.int32)
    agree2 = jnp.arange(N2) % 3 == 0
    label2 = jnp.where(agree2, tea_arg2, rand_lab2)

    loss2 = jax.block_until_ready(gkd_loss(stu2, tea2, label2, T, row_tile=16))
    ref2 = _gkd_loss_ref(
        stu2.astype(jnp.float32), tea2.astype(jnp.float32), label2, T
    )
    assert jnp.allclose(loss2, ref2, rtol=1e-4, atol=1e-4), (loss2, ref2)

    print("KERNEL_OK")
</pallas_src>

<mosaic_0001>
module attributes {stable_mosaic.version = 11 : i64} {
  func.func @_gkd_kernel(%arg0: i32, %arg1: memref<8x128xf32, #tpu.memory_space<vmem>>, %arg2: memref<8x128xf32, #tpu.memory_space<vmem>>, %arg3: memref<8x1xi32, #tpu.memory_space<vmem>>, %arg4: memref<1x1x1xf32, #tpu.memory_space<vmem>>, %arg5: memref<1x1x1xf32, #tpu.memory_space<vmem>>) attributes {dimension_semantics = [#tpu.dimension_semantics<parallel>], iteration_bounds = array<i64: 1>, scalar_prefetch = 0 : i64, scratch_operands = 0 : i64, tpu.core_type = #tpu.core_type<tc>, window_params = [{transform_indices = @transform_0, window_bounds = array<i64: 8, 128>}, {transform_indices = @transform_1, window_bounds = array<i64: 8, 128>}, {transform_indices = @transform_2, window_bounds = array<i64: 8, 1>}, {transform_indices = @transform_3, window_bounds = array<i64: 1, 1, 1>}, {transform_indices = @transform_4, window_bounds = array<i64: 1, 1, 1>}]} {
    %c0 = arith.constant 0 : index
    %c0_0 = arith.constant 0 : index
    %0 = vector.load %arg1[%c0, %c0_0] : memref<8x128xf32, #tpu.memory_space<vmem>>, vector<8x128xf32>
    %cst = arith.constant 2.500000e-01 : f32
    %1 = vector.broadcast %cst : f32 to vector<8x128xf32>
    %2 = arith.mulf %0, %1 : vector<8x128xf32>
    %c0_1 = arith.constant 0 : index
    %c0_2 = arith.constant 0 : index
    %3 = vector.load %arg2[%c0_1, %c0_2] : memref<8x128xf32, #tpu.memory_space<vmem>>, vector<8x128xf32>
    %cst_3 = arith.constant 2.500000e-01 : f32
    %4 = vector.broadcast %cst_3 : f32 to vector<8x128xf32>
    %5 = arith.mulf %3, %4 : vector<8x128xf32>
    %cst_4 = arith.constant dense<0xFF800000> : vector<8xf32>
    %6 = vector.multi_reduction <maximumf>, %2, %cst_4 [1] : vector<8x128xf32> to vector<8xf32>
    %7 = vector.shape_cast %6 : vector<8xf32> to vector<8x1xf32>
    %8 = vector.broadcast %7 : vector<8x1xf32> to vector<8x128xf32>
    %9 = arith.subf %2, %8 : vector<8x128xf32>
    %10 = math.exp %9 : vector<8x128xf32>
    %cst_5 = arith.constant dense<0.000000e+00> : vector<8xf32>
    %11 = vector.multi_reduction <add>, %10, %cst_5 [1] : vector<8x128xf32> to vector<8xf32>
    %12 = vector.shape_cast %11 : vector<8xf32> to vector<8x1xf32>
    %13 = math.log %12 : vector<8x1xf32>
    %cst_6 = arith.constant dense<0xFF800000> : vector<8xf32>
    %14 = vector.multi_reduction <maximumf>, %5, %cst_6 [1] : vector<8x128xf32> to vector<8xf32>
    %15 = vector.shape_cast %14 : vector<8xf32> to vector<8x1xf32>
    %16 = vector.broadcast %15 : vector<8x1xf32> to vector<8x128xf32>
    %17 = arith.subf %5, %16 : vector<8x128xf32>
    %18 = math.exp %17 : vector<8x128xf32>
    %cst_7 = arith.constant dense<0.000000e+00> : vector<8xf32>
    %19 = vector.multi_reduction <add>, %18, %cst_7 [1] : vector<8x128xf32> to vector<8xf32>
    %20 = vector.shape_cast %19 : vector<8xf32> to vector<8x1xf32>
    %21 = arith.subf %17, %9 : vector<8x128xf32>
    %22 = arith.mulf %18, %21 : vector<8x128xf32>
    %cst_8 = arith.constant dense<0.000000e+00> : vector<8xf32>
    %23 = vector.multi_reduction <add>, %22, %cst_8 [1] : vector<8x128xf32> to vector<8xf32>
    %24 = vector.shape_cast %23 : vector<8xf32> to vector<8x1xf32>
    %25 = arith.divf %24, %20 : vector<8x1xf32>
    %26 = math.log %20 : vector<8x1xf32>
    %27 = arith.subf %26, %13 : vector<8x1xf32>
    %28 = arith.subf %25, %27 : vector<8x1xf32>
    %29 = tpu.iota {dimensions = array<i32: 1>} : vector<8x128xi32>
    %c0_9 = arith.constant 0 : index
    %c0_10 = arith.constant 0 : index
    %30 = vector.load %arg3[%c0_9, %c0_10] : memref<8x1xi32, #tpu.memory_space<vmem>>, vector<8x1xi32>
    %31 = vector.broadcast %15 : vector<8x1xf32> to vector<8x128xf32>
    %32 = arith.cmpf oeq, %5, %31 : vector<8x128xf32>
    %33 = vector.broadcast %30 : vector<8x1xi32> to vector<8x128xi32>
    %34 = arith.cmpi eq, %29, %33 : vector<8x128xi32>
    %35 = arith.andi %32, %34 : vector<8x128xi1>
    %36 = arith.extui %35 : vector<8x128xi1> to vector<8x128xi32>
    %37 = arith.sitofp %36 : vector<8x128xi32> to vector<8x128xf32>
    %cst_11 = arith.constant dense<0xFF800000> : vector<8xf32>
    %38 = vector.multi_reduction <maximumf>, %37, %cst_11 [1] : vector<8x128xf32> to vector<8xf32>
    %39 = vector.shape_cast %38 : vector<8xf32> to vector<8x1xf32>
    %40 = arith.mulf %39, %28 : vector<8x1xf32>
    %cst_12 = arith.constant dense<0.000000e+00> : vector<1xf32>
    %41 = vector.multi_reduction <add>, %40, %cst_12 [0] : vector<8x1xf32> to vector<1xf32>
    %42 = vector.shape_cast %41 : vector<1xf32> to vector<1x1xf32>
    %43 = vector.shape_cast %42 : vector<1x1xf32> to vector<1x1x1xf32>
    %c0_13 = arith.constant 0 : index
    %c0_14 = arith.constant 0 : index
    %c0_15 = arith.constant 0 : index
    %44 = vector.load %arg4[%c0_13, %c0_14, %c0_15] : memref<1x1x1xf32, #tpu.memory_space<vmem>>, vector<1x1x1xf32>
    tpu.vector_store %arg4[%c0_13, %c0_14, %c0_15], %43 {strides = array<i32>} : memref<1x1x1xf32, #tpu.memory_space<vmem>>, vector<1x1x1xf32>,
    %cst_16 = arith.constant dense<0.000000e+00> : vector<1xf32>
    %45 = vector.multi_reduction <add>, %39, %cst_16 [0] : vector<8x1xf32> to vector<1xf32>
    %46 = vector.shape_cast %45 : vector<1xf32> to vector<1x1xf32>
    %47 = vector.shape_cast %46 : vector<1x1xf32> to vector<1x1x1xf32>
    %c0_17 = arith.constant 0 : index
    %c0_18 = arith.constant 0 : index
    %c0_19 = arith.constant 0 : index
    %48 = vector.load %arg5[%c0_17, %c0_18, %c0_19] : memref<1x1x1xf32, #tpu.memory_space<vmem>>, vector<1x1x1xf32>
    tpu.vector_store %arg5[%c0_17, %c0_18, %c0_19], %47 {strides = array<i32>} : memref<1x1x1xf32, #tpu.memory_space<vmem>>, vector<1x1x1xf32>,
    return
  }
  func.func @transform_0(%arg0: i32) -> (i32, i32) {
    %c0_i32 = arith.constant 0 : i32
    %c0_i32_0 = arith.constant 0 : i32
    return %arg0, %c0_i32 : i32, i32
  }
  func.func @transform_1(%arg0: i32) -> (i32, i32) {
    %c0_i32 = arith.constant 0 : i32
    %c0_i32_0 = arith.constant 0 : i32
    return %arg0, %c0_i32 : i32, i32
  }
  func.func @transform_2(%arg0: i32) -> (i32, i32) {
    %c0_i32 = arith.constant 0 : i32
    %c0_i32_0 = arith.constant 0 : i32
    return %arg0, %c0_i32 : i32, i32
  }
  func.func @transform_3(%arg0: i32) -> (i32, i32, i32) {
    %c0_i32 = arith.constant 0 : i32
    %c0_i32_0 = arith.constant 0 : i32
    %c0_i32_1 = arith.constant 0 : i32
    return %arg0, %c0_i32, %c0_i32_0 : i32, i32, i32
  }
  func.func @transform_4(%arg0: i32) -> (i32, i32, i32) {
    %c0_i32 = arith.constant 0 : i32
    %c0_i32_0 = arith.constant 0 : i32
    %c0_i32_1 = arith.constant 0 : i32
    return %arg0, %c0_i32, %c0_i32_0 : i32, i32, i32
  }
}

</mosaic_0001>

<bundles_post_ra>
// kernel: tpu_custom_call.1
= control target key start
LH: loop header
LB: loop body
LE: loop exit
PB: predicated region body
PF: predicated region fallthrough
CT: control target
= control target key end

     0   :  { %10 = vsyncpa [#allocation3], 0  ;;  %s280_s0 = inlined_call_operand.vmem [shape: f32[8,128], index: 0, kind: input, shape index: {}]   ;;  %s281_s1 = inlined_call_operand.hbm [shape: f32[8,128], index: 1, kind: input, shape index: {}]   ;;  %s282_s2 = inlined_call_operand.vmem [shape: s32[8,1], index: 2, kind: input, shape index: {}]   ;;  %s283_s3 = inlined_call_operand.hbm [shape: f32[1,1,1], index: 3, kind: output, shape index: {0}]   ;;  %s284_s4 = inlined_call_operand.hbm [shape: f32[1,1,1], index: 4, kind: output, shape index: {1}]  }
   0x1   :  { %11 = vsyncpa [#allocation4], 0 }
   0x2   :  { %12 = vsyncpa [#allocation7], 0  ;;  %s20_s17 = sshll.u32 %s281_s1, 4  ;;  %s233_s18 = smov [#allocation2]   ;;  %s21_s17 = int_to_ptr.hbm [resolvable:$true] %s20_s17 }
   0x3   :  { %s22_s19 = sshll.u32 %s233_s18, 4  ;;  %s23_s19 = int_to_ptr.vmem [resolvable:$true] %s22_s19 }
   0x4   :  { %25 = dma.hbm_to_vmem [thread:$0]  %s21_s17, 128, %s23_s19, [#allocation3]  }
   0x5   :  { %227 = dma.done.wait [#allocation3], 128  }
   0x6   :  { %228 = vsyncadd [#allocation3], 4294967168  ;;  %v234_v0 = vmov 0   ;;  %v34_v1 = vld [vmem:[#allocation2] sm:$0xff]  ;;  %v75_v6 = vlaneseq  ;;  %v235_v12 = vmov 0.0   ;;  %s122_s25 = sshll.u32 %s284_s4, 4  ;;  %s123_s25 = int_to_ptr.hbm [resolvable:$true] %s122_s25 }
   0x7   :  { %143 = vset.pattern.permute.xlu1 %v234_v0  ;;  %144 = vset.pattern.permute.xlu0 %v234_v0  ;;  %v77_v2 = vld [vmem:[%s282_s2] sm:$0xff]  ;;  %v35_v3 = vmul.f32 0.25, %v34_v1  ;;  %vm95_vm3 = vcmask 0   ;;  %s237_s4 = smov [#allocation5]   ;;  %s111_s29 = sshll.u32 %s283_s3, 4  ;;  %s112_s29 = int_to_ptr.hbm [resolvable:$true] %s111_s29 }
   0x8   :  { %80 = vperm.xlu1 %143, %v77_v2   ;;  %v32_v4 = vld [vmem:[%s280_s0] sm:$0xff]  ;;  %v76_v7 = vand.u32 127, %v75_v6  ;;  %s236_s0 = smov [#allocation6]   ;;  %s109_s26 = sshll.u32 %s237_s4, 4  ;;  %s110_s26 = int_to_ptr.vmem [resolvable:$true] %s109_s26 }
   0x9   :  { %45 = vmax.xlane.f32.xlu0 %v35_v3  ;;  %v33_v5 = vmul.f32 0.25, %v32_v4  ;;  %s120_s2 = sshll.u32 %s236_s0, 4  ;;  %s121_s2 = int_to_ptr.vmem [resolvable:$true] %s120_s2 }
  0x11   :  { %36 = vmax.xlane.f32.xlu0 %v33_v5 }
  0x7a   :  { %v81_v8 = vpop.permute.xlu1 %80 }
  0x7b   :  { %vm82_vm0 = vcmp.eq.s32.totalorder %v76_v7, %v81_v8 }
  0x7c   :  { %v46_v9 = vpop.xlane.xlu0 %45 }
  0x7d   :  { %v47_v10 = vsub.f32 %v35_v3, %v46_v9  ;;  %vm78_vm1 = vcmp.eq.f32.partialorder %v35_v3, %v46_v9 }
  0x7e   :  { %vm83_vm2 = vmand %vm78_vm1, %vm82_vm0 }
  0x7f   :  { %v48_v11 = vmul.f32 1.442695, %v47_v10  ;;  %v137_v13 = vsel %vm83_vm2, 1.0, %v235_v12 }
  0x80   :  { %86 = vmax.xlane.f32.xlu0 %v137_v13 }
  0x81   :  { %145 = vpow2.f32 %v48_v11 }
  0x84   :  { %v37_v14 = vpop.xlane.xlu0 %36 }
  0x85   :  { %v38_v15 = vsub.f32 %v33_v5, %v37_v14 }
  0x87   :  { %v146_v16 = vpop.eup %145  ;;  %v39_v17 = vmul.f32 1.442695, %v38_v15  ;;  %v52_v19 = vsub.f32 %v47_v10, %v38_v15 }
  0x88   :  { %50 = vadd.xlane.f32.xlu1 %v146_v16 }
  0x89   :  { %147 = vpow2.f32 %v39_v17  ;;  %v53_v20 = vmul.f32 %v146_v16, %v52_v19 }
  0x8f   :  { %v148_v18 = vpop.eup %147 }
  0x90   :  { %41 = vadd.xlane.f32.xlu2 %v148_v18 }
  0x98   :  { %54 = vadd.xlane.f32.xlu2 %v53_v20 }
  0xf3   :  { %v87_v21 = vpop.xlane.xlu0 %86 }
  0xf4   :  { %v97_v22 = vrot.slane %v87_v21, 4 }
  0xf6   :  { %v98_v23 = vadd.f32 %v97_v22, %v87_v21 }
  0xf8   :  { %v99_v24 = vrot.slane %v98_v23, 2 }
  0xfa   :  { %v100_v25 = vadd.f32 %v99_v24, %v98_v23 }
  0xfb   :  { %v51_v26 = vpop.xlane.xlu1 %50 }
  0xfc   :  { %v101_v27 = vrot.slane %v100_v25, 1  ;;  %149 = vrcp.f32 %v51_v26  ;;  %v67_v33 = vand.u32 2147483648, %v51_v26  ;;  %v65_v35 = vand.u32 2147483647, %v51_v26 }
  0xfd   :  { %151 = vlog2.f32 %v51_v26  ;;  %vm61_vm5 = vweird.f32 %v51_v26 }
  0xfe   :  { %v102_v28 = vadd.f32 %v101_v27, %v100_v25  ;;  %v68_v39 = vor.u32 1.1754944e-38, %v67_v33  ;;  %vm66_vm7 = vcmp.eq.f32.partialorder %v65_v35, 8.507059e+37 }
 0x100   :  { %103 = vst.msk [vmem:[#allocation6] sm:$0x1] %vm95_vm3, %v102_v28 }
 0x101   :  { %125 = dma.vmem_to_hbm [thread:$0]  %s121_s2, 16, %s123_s25, [#allocation7]  }
 0x102   :  { %v150_v29 = vpop.eup %149 }
 0x103   :  { %v57_v30 = vmul.f32 %v150_v29, %v51_v26  ;;  %v42_v31 = vpop.xlane.xlu2 %41  ;;  %vm62_vm4 = vweird.f32 %v150_v29  ;;  %v152_v36 = vpop.eup %151 }
 0x104   :  { %153 = vlog2.f32 %v42_v31  ;;  %vm63_vm6 = vmor %vm61_vm5, %vm62_vm4  ;;  %v72_v40 = vmul.f32 0.6931472, %v152_v36 }
 0x105   :  { %v58_v32 = vsub.f32 1.0, %v57_v30 }
 0x107   :  { %v59_v34 = vmul.f32 %v150_v29, %v58_v32 }
 0x109   :  { %v60_v37 = vadd.f32 %v150_v29, %v59_v34 }
 0x10a   :  { %v154_v38 = vpop.eup %153 }
 0x10b   :  { %v44_v41 = vmul.f32 0.6931472, %v154_v38  ;;  %v64_v42 = vsel %vm63_vm6, %v150_v29, %v60_v37  ;;  %v55_v43 = vpop.xlane.xlu2 %54 }
 0x10c   :  { %v69_v44 = vsel %vm66_vm7, %v68_v39, %v64_v42 }
 0x10d   :  { %v73_v45 = vsub.f32 %v72_v40, %v44_v41  ;;  %v70_v46 = vmul.f32 %v69_v44, %v55_v43 }
 0x10f   :  { %v74_v47 = vsub.f32 %v70_v46, %v73_v45 }
 0x111   :  { %v88_v48 = vmul.f32 %v87_v21, %v74_v47 }
 0x113   :  { %v89_v49 = vrot.slane %v88_v48, 4 }
 0x115   :  { %v90_v50 = vadd.f32 %v89_v49, %v88_v48 }
 0x117   :  { %v91_v51 = vrot.slane %v90_v50, 2 }
 0x119   :  { %v92_v52 = vadd.f32 %v91_v51, %v90_v50 }
 0x11b   :  { %v93_v53 = vrot.slane %v92_v52, 1 }
 0x11d   :  { %v94_v54 = vadd.f32 %v93_v53, %v92_v52 }
 0x11f   :  { %96 = vst.msk [vmem:[#allocation5] sm:$0x1] %vm95_vm3, %v94_v54 }
 0x120   :  { %114 = dma.vmem_to_hbm [thread:$0]  %s110_s26, 16, %s112_s29, [#allocation4]  }
 0x121   :  { %229 = dma.done.wait [#allocation4], 16  }
 0x122   :  { %230 = vsyncadd [#allocation4], 4294967280 }
 0x123   :  { %231 = dma.done.wait [#allocation7], 16  }
 0x124   :  { %232 = vsyncadd [#allocation7], 4294967280 }
 0x125   :  { %134 = vsyncpa [#allocation3], 1 }
 0x126   :  { %135 = vsyncpa [#allocation4], 1 }
 0x127   :  { %136 = vsyncpa [#allocation7], 1 }

</bundles_post_ra>
